<compile_context>
chip_gen: v5e
topology: v5e:2x2
jax: 0.10.0
libtpu: 0.0.40
codegen_flags: <defaults>
</compile_context>

<pallas_src>
import functools

import jax
import jax.numpy as jnp
from jax.experimental import pallas as pl
from jax.experimental.pallas import tpu as pltpu


_EPS = 1e-12   # torch.nn.functional.normalize default eps
_ENC = 64      # width of every encoder segment


def _round_up(n, m):
    return ((n + m - 1) // m) * m


# ---------------------------------------------------------------------------
# Pallas kernel: full ActorUp_MemAug forward for one batch tile
# ---------------------------------------------------------------------------
def _actor_up_memaug_kernel(
    x_ref, m_ref, u_ref, r_ref, h_ref,
    w_obs_ref, w_msg_ref, w_act_ref, w_rew_ref,
    b_pack_ref, w_add_ref, w_dec_ref, b_dec_ref,
    out_ref, *, msg_dim,
):
    f32 = jnp.float32

    def enc(v, w_ref, brow):
        # Linear -> L2 normalize (rsqrt on EUP) -> tanh (tanh distributes over
        # the concat that feeds add_h_encoder, so it is applied per segment).
        e = jnp.dot(v, w_ref[...], preferred_element_type=f32) \
            + b_pack_ref[brow:brow + 1, :]
        ss = jnp.sum(e * e, axis=-1, keepdims=True)
        inv = jax.lax.rsqrt(jnp.maximum(ss, _EPS * _EPS))   # 1/max(||e||, eps)
        return jnp.tanh(e * inv)

    xe = enc(x_ref[...], w_obs_ref, 0)
    me = enc(m_ref[...], w_msg_ref, 1)
    ue = enc(u_ref[...], w_act_ref, 2)
    re = enc(r_ref[...], w_rew_ref, 3)
    ht = jnp.tanh(h_ref[...])

    # add_h_encoder on concat([xe, me, ue, re, h]): the concat never exists —
    # it is a sum of partial matmuls against static row-slices of w_add.
    z = (jnp.dot(xe, w_add_ref[0 * _ENC:1 * _ENC, :], preferred_element_type=f32)
         + jnp.dot(me, w_add_ref[1 * _ENC:2 * _ENC, :], preferred_element_type=f32)
         + jnp.dot(ue, w_add_ref[2 * _ENC:3 * _ENC, :], preferred_element_type=f32)
         + jnp.dot(re, w_add_ref[3 * _ENC:4 * _ENC, :], preferred_element_type=f32)
         + jnp.dot(ht, w_add_ref[4 * _ENC:, :], preferred_element_type=f32)
         + b_pack_ref[4:5, :])
    comb = jnp.tanh(z)                                               # (Bt, 64)

    # Fused, lane-padded decoder: one matmul, one lane-dense store.
    # Columns [0, msg_dim) -> L2-normalized message; [msg_dim, msg_dim+h_dim)
    # -> tanh hidden state; padded columns are exact zeros (sliced off later).
    dec = jnp.dot(comb, w_dec_ref[...], preferred_element_type=f32) + b_dec_ref[...]
    col = jax.lax.broadcasted_iota(jnp.int32, dec.shape, 1)
    is_msg = col < msg_dim
    msg_ss = jnp.sum(jnp.where(is_msg, dec * dec, 0.0), axis=-1, keepdims=True)
    msg_inv = jax.lax.rsqrt(jnp.maximum(msg_ss, _EPS * _EPS))
    out_ref[...] = jnp.where(is_msg, dec * msg_inv, jnp.tanh(dec))


# ---------------------------------------------------------------------------
# One-time weight packing (hoisted out of the jitted forward)
# ---------------------------------------------------------------------------
def pack_params(params, *, msg_dim, h_dim):
    """Pack small biases and lane-pad the decoder ONCE at init time."""
    f32 = jnp.float32

    # Biases: rows 0..3 = [obs, msg, act, rew] encoder biases, row 4 = add_h.
    b_pack = jnp.zeros((8, _ENC), f32)
    for i, name in enumerate(("obs", "msg", "act", "rew", "add")):
        b_pack = b_pack.at[i:i + 1, :].set(params[f"b_{name}"])

    dec_dim = msg_dim + h_dim
    dec_pad = max(128, _round_up(dec_dim, 128))
    # TODO(synk): if msg_dim + h_dim ever exceeds 128, split into two
    # lane-dense outputs instead of growing the zero-padded block.
    w_dec = jnp.zeros((_ENC, dec_pad), f32)
    w_dec = w_dec.at[:, :msg_dim].set(params["w_mdec"])
    w_dec = w_dec.at[:, msg_dim:dec_dim].set(params["w_hdec"])
    b_dec = jnp.zeros((1, dec_pad), f32)
    b_dec = b_dec.at[:, :msg_dim].set(params["b_mdec"])
    b_dec = b_dec.at[:, msg_dim:dec_dim].set(params["b_hdec"])

    return {
        "w_obs": params["w_obs"], "w_msg": params["w_msg"],
        "w_act": params["w_act"], "w_rew": params["w_rew"],
        "b_pack": b_pack,
        "w_add": params["w_add"],          # (4*64 + h_dim, 64)
        "w_dec": w_dec, "b_dec": b_dec,    # lane-padded decoder
    }


def _choose_b_tile(B):
    # Small/moderate batch: one full-batch tile (block == array dim is always
    # legal, even when B is not a multiple of 8).
    if B <= 256:
        return B
    # Large batch: big tiles (multiple of 8), capped at 1024 rows, with >=2
    # grid steps so the "parallel" axis shards across both TCs on v7x.
    return max(8, min(1024, _round_up(pl.cdiv(B, 2), 8)))


# ---------------------------------------------------------------------------
# Forward wrapper
# ---------------------------------------------------------------------------
@functools.partial(jax.jit, static_argnames=("msg_dim", "h_dim"))
def actor_up_memaug_forward(x, u, r, h, m, packed, *, msg_dim, h_dim):
    f32 = jnp.float32
    B = x.shape[0]
    d_obs, d_msg, d_act, d_rew = x.shape[1], m.shape[1], u.shape[1], r.shape[1]
    dec_dim = msg_dim + h_dim
    dec_pad = packed["w_dec"].shape[1]

    b_tile = _choose_b_tile(B)
    grid = (pl.cdiv(B, b_tile),)

    def bspec(feat):                     # batch-tiled operands
        return pl.BlockSpec((b_tile, feat), lambda i: (i, 0))

    def cspec(shape):                    # grid-invariant constants (fetched once)
        return pl.BlockSpec(shape, lambda i: (0,) * len(shape))

    flops = 2 * B * ((d_obs + d_msg + d_act + d_rew) * _ENC
                     + (4 * _ENC + h_dim) * _ENC
                     + _ENC * dec_pad)
    transc = B * (4 * _ENC + h_dim + _ENC + dec_pad + 5)
    bytes_acc = 4 * (B * (d_obs + d_msg + d_act + d_rew + h_dim + dec_pad)
                     + sum(int(v.size) for v in packed.values()))

    dec_full = pl.pallas_call(
        functools.partial(_actor_up_memaug_kernel, msg_dim=msg_dim),
        out_shape=jax.ShapeDtypeStruct((B, dec_pad), f32),
        grid=grid,
        in_specs=[
            bspec(d_obs), bspec(d_msg), bspec(d_act), bspec(d_rew), bspec(h_dim),
            cspec(packed["w_obs"].shape), cspec(packed["w_msg"].shape),
            cspec(packed["w_act"].shape), cspec(packed["w_rew"].shape),
            cspec(packed["b_pack"].shape), cspec(packed["w_add"].shape),
            cspec(packed["w_dec"].shape), cspec(packed["b_dec"].shape),
        ],
        out_specs=bspec(dec_pad),
        compiler_params=pltpu.CompilerParams(
            dimension_semantics=("parallel",)),
        cost_estimate=pl.CostEstimate(
            flops=int(flops), transcendentals=int(transc),
            bytes_accessed=int(bytes_acc)),
    )(x, m, u, r, h,
      packed["w_obs"], packed["w_msg"], packed["w_act"], packed["w_rew"],
      packed["b_pack"], packed["w_add"], packed["w_dec"], packed["b_dec"])

    return dec_full[:, :msg_dim], dec_full[:, msg_dim:dec_dim]


# ---------------------------------------------------------------------------
# Deterministic parameter construction (PyTorch nn.Linear shapes, transposed)
# ---------------------------------------------------------------------------
def init_params(key, state_dim, action_dim_0, reward_dim_0, msg_dim, h_dim,
                max_children):
    dims = {
        "obs": (state_dim, 64),
        "act": (action_dim_0, 64),
        "rew": (reward_dim_0, 64),
        "msg": (msg_dim * max_children, 64),
        "add": (64 + 64 + 64 + 64 + h_dim, 64),
        "mdec": (64, msg_dim),
        "hdec": (64, h_dim),
    }
    params = {}
    for name, (din, dout) in dims.items():
        key, kw, kb = jax.random.split(key, 3)
        bound = 1.0 / jnp.sqrt(din)
        # stored as (in, out) so kernel does x @ W
        params[f"w_{name}"] = jax.random.uniform(
            kw, (din, dout), jnp.float32, -bound, bound)
        params[f"b_{name}"] = jax.random.uniform(
            kb, (1, dout), jnp.float32, -bound, bound)
    return params


# ---------------------------------------------------------------------------
# Pure-JAX reference (mirrors the PyTorch module exactly)
# ---------------------------------------------------------------------------
def reference_forward(x, u, r, h, m, params):
    def lin(v, w, b):
        return v @ w + b

    def l2n(v):
        n = jnp.sqrt(jnp.sum(v * v, axis=-1, keepdims=True))
        return v / jnp.maximum(n, 1e-12)

    xe = l2n(lin(x, params["w_obs"], params["b_obs"]))
    ue = l2n(lin(u, params["w_act"], params["b_act"]))
    re = l2n(lin(r, params["w_rew"], params["b_rew"]))
    me = l2n(lin(m, params["w_msg"], params["b_msg"]))
    comb = jnp.concatenate([xe, me, ue, re, h], axis=-1)
    comb = jnp.tanh(lin(jnp.tanh(comb), params["w_add"], params["b_add"]))
    msg_up = l2n(lin(comb, params["w_mdec"], params["b_mdec"]))
    new_h = jnp.tanh(lin(comb, params["w_hdec"], params["b_hdec"]))
    return msg_up, new_h


if __name__ == "__main__":
    # Small shapes consistent with the module
    state_dim = 32
    action_dim_0 = 8
    reward_dim_0 = 4
    msg_dim = 16
    h_dim = 32
    max_children = 2

    key = jax.random.PRNGKey(0)
    kp, kdata = jax.random.split(key)

    params = init_params(kp, state_dim, action_dim_0, reward_dim_0,
                         msg_dim, h_dim, max_children)
    packed = pack_params(params, msg_dim=msg_dim, h_dim=h_dim)   # once, off hot path

    def make_inputs(k, B):
        kx, ku, kr, kh, km1, km2 = jax.random.split(k, 6)
        x = jax.random.normal(kx, (B, state_dim), jnp.float32)
        u = jax.random.normal(ku, (B, action_dim_0), jnp.float32)
        r = jax.random.normal(kr, (B, reward_dim_0), jnp.float32)
        h = jax.random.normal(kh, (B, h_dim), jnp.float32)
        # two child messages (*m varargs), concatenated on the last dim
        m1 = jax.random.normal(km1, (B, msg_dim), jnp.float32)
        m2 = jax.random.normal(km2, (B, msg_dim), jnp.float32)
        m = jnp.concatenate([m1, m2], axis=-1)
        return x, u, r, h, m

    k_small, k_big = jax.random.split(kdata)

    # --- tiny batch (single grid step) --------------------------------------
    B = 2
    x, u, r, h, m = make_inputs(k_small, B)
    msg_up, new_hidden = actor_up_memaug_forward(
        x, u, r, h, m, packed, msg_dim=msg_dim, h_dim=h_dim)
    jax.block_until_ready((msg_up, new_hidden))
    ref_msg, ref_h = reference_forward(x, u, r, h, m, params)
    assert msg_up.shape == (B, msg_dim)
    assert new_hidden.shape == (B, h_dim)
    assert jnp.allclose(msg_up, ref_msg, atol=2e-5, rtol=2e-5)
    assert jnp.allclose(new_hidden, ref_h, atol=2e-5, rtol=2e-5)

    # --- larger, non-multiple batch (2 grid steps, ragged last tile) --------
    B2 = 300
    x2, u2, r2, h2, m2 = make_inputs(k_big, B2)
    msg_up2, new_hidden2 = actor_up_memaug_forward(
        x2, u2, r2, h2, m2, packed, msg_dim=msg_dim, h_dim=h_dim)
    jax.block_until_ready((msg_up2, new_hidden2))
    ref_msg2, ref_h2 = reference_forward(x2, u2, r2, h2, m2, params)
    assert msg_up2.shape == (B2, msg_dim)
    assert new_hidden2.shape == (B2, h_dim)
    assert jnp.allclose(msg_up2, ref_msg2, atol=1e-4, rtol=1e-4)
    assert jnp.allclose(new_hidden2, ref_h2, atol=1e-4, rtol=1e-4)

    print("KERNEL_OK")
</pallas_src>

<mosaic_0001>
module attributes {stable_mosaic.version = 11 : i64} {
  func.func @_actor_up_memaug_kernel(%arg0: i32, %arg1: memref<2x32xf32, #tpu.memory_space<vmem>>, %arg2: memref<2x32xf32, #tpu.memory_space<vmem>>, %arg3: memref<2x8xf32, #tpu.memory_space<vmem>>, %arg4: memref<2x4xf32, #tpu.memory_space<vmem>>, %arg5: memref<2x32xf32, #tpu.memory_space<vmem>>, %arg6: memref<32x64xf32, #tpu.memory_space<vmem>>, %arg7: memref<32x64xf32, #tpu.memory_space<vmem>>, %arg8: memref<8x64xf32, #tpu.memory_space<vmem>>, %arg9: memref<4x64xf32, #tpu.memory_space<vmem>>, %arg10: memref<8x64xf32, #tpu.memory_space<vmem>>, %arg11: memref<288x64xf32, #tpu.memory_space<vmem>>, %arg12: memref<64x128xf32, #tpu.memory_space<vmem>>, %arg13: memref<1x128xf32, #tpu.memory_space<vmem>>, %arg14: memref<2x128xf32, #tpu.memory_space<vmem>>) attributes {dimension_semantics = [#tpu.dimension_semantics<parallel>], iteration_bounds = array<i64: 1>, scalar_prefetch = 0 : i64, scratch_operands = 0 : i64, tpu.core_type = #tpu.core_type<tc>, window_params = [{transform_indices = @transform_0, window_bounds = array<i64: 2, 32>}, {transform_indices = @transform_1, window_bounds = array<i64: 2, 32>}, {transform_indices = @transform_2, window_bounds = array<i64: 2, 8>}, {transform_indices = @transform_3, window_bounds = array<i64: 2, 4>}, {transform_indices = @transform_4, window_bounds = array<i64: 2, 32>}, {pipeline_mode = #tpu.pipeline_mode<synchronous>, transform_indices = @transform_5, window_bounds = array<i64: 32, 64>}, {pipeline_mode = #tpu.pipeline_mode<synchronous>, transform_indices = @transform_6, window_bounds = array<i64: 32, 64>}, {pipeline_mode = #tpu.pipeline_mode<synchronous>, transform_indices = @transform_7, window_bounds = array<i64: 8, 64>}, {pipeline_mode = #tpu.pipeline_mode<synchronous>, transform_indices = @transform_8, window_bounds = array<i64: 4, 64>}, {pipeline_mode = #tpu.pipeline_mode<synchronous>, transform_indices = @transform_9, window_bounds = array<i64: 8, 64>}, {pipeline_mode = #tpu.pipeline_mode<synchronous>, transform_indices = @transform_10, window_bounds = array<i64: 288, 64>}, {pipeline_mode = #tpu.pipeline_mode<synchronous>, transform_indices = @transform_11, window_bounds = array<i64: 64, 128>}, {pipeline_mode = #tpu.pipeline_mode<synchronous>, transform_indices = @transform_12, window_bounds = array<i64: 1, 128>}, {transform_indices = @transform_13, window_bounds = array<i64: 2, 128>}]} {
    %c0 = arith.constant 0 : index
    %c0_0 = arith.constant 0 : index
    %0 = vector.load %arg1[%c0, %c0_0] : memref<2x32xf32, #tpu.memory_space<vmem>>, vector<2x32xf32>
    %c0_1 = arith.constant 0 : index
    %c0_2 = arith.constant 0 : index
    %1 = vector.load %arg6[%c0_1, %c0_2] : memref<32x64xf32, #tpu.memory_space<vmem>>, vector<32x64xf32>
    %cst = arith.constant dense<0.000000e+00> : vector<2x64xf32>
    %2 = tpu.matmul %0, %1, %cst {dimension_numbers = #tpu.dot_dimension_numbers<[1], [0], [0], [1], [0, 0, 1, 1], [], []>} : vector<2x32xf32>, vector<32x64xf32>, vector<2x64xf32> -> vector<2x64xf32>
    %c0_3 = arith.constant 0 : index
    %c0_4 = arith.constant 0 : index
    %3 = vector.load %arg10[%c0_3, %c0_4] : memref<8x64xf32, #tpu.memory_space<vmem>>, vector<1x64xf32>
    %4 = vector.broadcast %3 : vector<1x64xf32> to vector<2x64xf32>
    %5 = arith.addf %2, %4 : vector<2x64xf32>
    %6 = arith.mulf %5, %5 : vector<2x64xf32>
    %cst_5 = arith.constant dense<0.000000e+00> : vector<2xf32>
    %7 = vector.multi_reduction <add>, %6, %cst_5 [1] : vector<2x64xf32> to vector<2xf32>
    %8 = vector.shape_cast %7 : vector<2xf32> to vector<2x1xf32>
    %cst_6 = arith.constant 1.000000e-24 : f32
    %9 = vector.broadcast %cst_6 : f32 to vector<2x1xf32>
    %10 = arith.maximumf %8, %9 : vector<2x1xf32>
    %11 = math.rsqrt %10 : vector<2x1xf32>
    %12 = vector.broadcast %11 : vector<2x1xf32> to vector<2x64xf32>
    %13 = arith.mulf %5, %12 : vector<2x64xf32>
    %14 = math.tanh %13 : vector<2x64xf32>
    %c0_7 = arith.constant 0 : index
    %c0_8 = arith.constant 0 : index
    %15 = vector.load %arg2[%c0_7, %c0_8] : memref<2x32xf32, #tpu.memory_space<vmem>>, vector<2x32xf32>
    %c0_9 = arith.constant 0 : index
    %c0_10 = arith.constant 0 : index
    %16 = vector.load %arg7[%c0_9, %c0_10] : memref<32x64xf32, #tpu.memory_space<vmem>>, vector<32x64xf32>
    %cst_11 = arith.constant dense<0.000000e+00> : vector<2x64xf32>
    %17 = tpu.matmul %15, %16, %cst_11 {dimension_numbers = #tpu.dot_dimension_numbers<[1], [0], [0], [1], [0, 0, 1, 1], [], []>} : vector<2x32xf32>, vector<32x64xf32>, vector<2x64xf32> -> vector<2x64xf32>
    %c1 = arith.constant 1 : index
    %c0_12 = arith.constant 0 : index
    %18 = vector.load %arg10[%c1, %c0_12] : memref<8x64xf32, #tpu.memory_space<vmem>>, vector<1x64xf32>
    %19 = vector.broadcast %18 : vector<1x64xf32> to vector<2x64xf32>
    %20 = arith.addf %17, %19 : vector<2x64xf32>
    %21 = arith.mulf %20, %20 : vector<2x64xf32>
    %cst_13 = arith.constant dense<0.000000e+00> : vector<2xf32>
    %22 = vector.multi_reduction <add>, %21, %cst_13 [1] : vector<2x64xf32> to vector<2xf32>
    %23 = vector.shape_cast %22 : vector<2xf32> to vector<2x1xf32>
    %cst_14 = arith.constant 1.000000e-24 : f32
    %24 = vector.broadcast %cst_14 : f32 to vector<2x1xf32>
    %25 = arith.maximumf %23, %24 : vector<2x1xf32>
    %26 = math.rsqrt %25 : vector<2x1xf32>
    %27 = vector.broadcast %26 : vector<2x1xf32> to vector<2x64xf32>
    %28 = arith.mulf %20, %27 : vector<2x64xf32>
    %29 = math.tanh %28 : vector<2x64xf32>
    %c0_15 = arith.constant 0 : index
    %c0_16 = arith.constant 0 : index
    %30 = vector.load %arg3[%c0_15, %c0_16] : memref<2x8xf32, #tpu.memory_space<vmem>>, vector<2x8xf32>
    %c0_17 = arith.constant 0 : index
    %c0_18 = arith.constant 0 : index
    %31 = vector.load %arg8[%c0_17, %c0_18] : memref<8x64xf32, #tpu.memory_space<vmem>>, vector<8x64xf32>
    %cst_19 = arith.constant dense<0.000000e+00> : vector<2x64xf32>
    %32 = tpu.matmul %30, %31, %cst_19 {dimension_numbers = #tpu.dot_dimension_numbers<[1], [0], [0], [1], [0, 0, 1, 1], [], []>} : vector<2x8xf32>, vector<8x64xf32>, vector<2x64xf32> -> vector<2x64xf32>
    %c2 = arith.constant 2 : index
    %c0_20 = arith.constant 0 : index
    %33 = vector.load %arg10[%c2, %c0_20] : memref<8x64xf32, #tpu.memory_space<vmem>>, vector<1x64xf32>
    %34 = vector.broadcast %33 : vector<1x64xf32> to vector<2x64xf32>
    %35 = arith.addf %32, %34 : vector<2x64xf32>
    %36 = arith.mulf %35, %35 : vector<2x64xf32>
    %cst_21 = arith.constant dense<0.000000e+00> : vector<2xf32>
    %37 = vector.multi_reduction <add>, %36, %cst_21 [1] : vector<2x64xf32> to vector<2xf32>
    %38 = vector.shape_cast %37 : vector<2xf32> to vector<2x1xf32>
    %cst_22 = arith.constant 1.000000e-24 : f32
    %39 = vector.broadcast %cst_22 : f32 to vector<2x1xf32>
    %40 = arith.maximumf %38, %39 : vector<2x1xf32>
    %41 = math.rsqrt %40 : vector<2x1xf32>
    %42 = vector.broadcast %41 : vector<2x1xf32> to vector<2x64xf32>
    %43 = arith.mulf %35, %42 : vector<2x64xf32>
    %44 = math.tanh %43 : vector<2x64xf32>
    %c0_23 = arith.constant 0 : index
    %c0_24 = arith.constant 0 : index
    %45 = vector.load %arg4[%c0_23, %c0_24] : memref<2x4xf32, #tpu.memory_space<vmem>>, vector<2x4xf32>
    %c0_25 = arith.constant 0 : index
    %c0_26 = arith.constant 0 : index
    %46 = vector.load %arg9[%c0_25, %c0_26] : memref<4x64xf32, #tpu.memory_space<vmem>>, vector<4x64xf32>
    %cst_27 = arith.constant dense<0.000000e+00> : vector<2x64xf32>
    %47 = tpu.matmul %45, %46, %cst_27 {dimension_numbers = #tpu.dot_dimension_numbers<[1], [0], [0], [1], [0, 0, 1, 1], [], []>} : vector<2x4xf32>, vector<4x64xf32>, vector<2x64xf32> -> vector<2x64xf32>
    %c3 = arith.constant 3 : index
    %c0_28 = arith.constant 0 : index
    %48 = vector.load %arg10[%c3, %c0_28] : memref<8x64xf32, #tpu.memory_space<vmem>>, vector<1x64xf32>
    %49 = vector.broadcast %48 : vector<1x64xf32> to vector<2x64xf32>
    %50 = arith.addf %47, %49 : vector<2x64xf32>
    %51 = arith.mulf %50, %50 : vector<2x64xf32>
    %cst_29 = arith.constant dense<0.000000e+00> : vector<2xf32>
    %52 = vector.multi_reduction <add>, %51, %cst_29 [1] : vector<2x64xf32> to vector<2xf32>
    %53 = vector.shape_cast %52 : vector<2xf32> to vector<2x1xf32>
    %cst_30 = arith.constant 1.000000e-24 : f32
    %54 = vector.broadcast %cst_30 : f32 to vector<2x1xf32>
    %55 = arith.maximumf %53, %54 : vector<2x1xf32>
    %56 = math.rsqrt %55 : vector<2x1xf32>
    %57 = vector.broadcast %56 : vector<2x1xf32> to vector<2x64xf32>
    %58 = arith.mulf %50, %57 : vector<2x64xf32>
    %59 = math.tanh %58 : vector<2x64xf32>
    %c0_31 = arith.constant 0 : index
    %c0_32 = arith.constant 0 : index
    %60 = vector.load %arg5[%c0_31, %c0_32] : memref<2x32xf32, #tpu.memory_space<vmem>>, vector<2x32xf32>
    %61 = math.tanh %60 : vector<2x32xf32>
    %c0_33 = arith.constant 0 : index
    %c0_34 = arith.constant 0 : index
    %62 = vector.load %arg11[%c0_33, %c0_34] : memref<288x64xf32, #tpu.memory_space<vmem>>, vector<64x64xf32>
    %cst_35 = arith.constant dense<0.000000e+00> : vector<2x64xf32>
    %63 = tpu.matmul %14, %62, %cst_35 {dimension_numbers = #tpu.dot_dimension_numbers<[1], [0], [0], [1], [0, 0, 1, 1], [], []>} : vector<2x64xf32>, vector<64x64xf32>, vector<2x64xf32> -> vector<2x64xf32>
    %c64 = arith.constant 64 : index
    %c0_36 = arith.constant 0 : index
    %64 = vector.load %arg11[%c64, %c0_36] : memref<288x64xf32, #tpu.memory_space<vmem>>, vector<64x64xf32>
    %cst_37 = arith.constant dense<0.000000e+00> : vector<2x64xf32>
    %65 = tpu.matmul %29, %64, %cst_37 {dimension_numbers = #tpu.dot_dimension_numbers<[1], [0], [0], [1], [0, 0, 1, 1], [], []>} : vector<2x64xf32>, vector<64x64xf32>, vector<2x64xf32> -> vector<2x64xf32>
    %66 = arith.addf %63, %65 : vector<2x64xf32>
    %c128 = arith.constant 128 : index
    %c0_38 = arith.constant 0 : index
    %67 = vector.load %arg11[%c128, %c0_38] : memref<288x64xf32, #tpu.memory_space<vmem>>, vector<64x64xf32>
    %cst_39 = arith.constant dense<0.000000e+00> : vector<2x64xf32>
    %68 = tpu.matmul %44, %67, %cst_39 {dimension_numbers = #tpu.dot_dimension_numbers<[1], [0], [0], [1], [0, 0, 1, 1], [], []>} : vector<2x64xf32>, vector<64x64xf32>, vector<2x64xf32> -> vector<2x64xf32>
    %69 = arith.addf %66, %68 : vector<2x64xf32>
    %c192 = arith.constant 192 : index
    %c0_40 = arith.constant 0 : index
    %70 = vector.load %arg11[%c192, %c0_40] : memref<288x64xf32, #tpu.memory_space<vmem>>, vector<64x64xf32>
    %cst_41 = arith.constant dense<0.000000e+00> : vector<2x64xf32>
    %71 = tpu.matmul %59, %70, %cst_41 {dimension_numbers = #tpu.dot_dimension_numbers<[1], [0], [0], [1], [0, 0, 1, 1], [], []>} : vector<2x64xf32>, vector<64x64xf32>, vector<2x64xf32> -> vector<2x64xf32>
    %72 = arith.addf %69, %71 : vector<2x64xf32>
    %c256 = arith.constant 256 : index
    %c0_42 = arith.constant 0 : index
    %73 = vector.load %arg11[%c256, %c0_42] : memref<288x64xf32, #tpu.memory_space<vmem>>, vector<32x64xf32>
    %cst_43 = arith.constant dense<0.000000e+00> : vector<2x64xf32>
    %74 = tpu.matmul %61, %73, %cst_43 {dimension_numbers = #tpu.dot_dimension_numbers<[1], [0], [0], [1], [0, 0, 1, 1], [], []>} : vector<2x32xf32>, vector<32x64xf32>, vector<2x64xf32> -> vector<2x64xf32>
    %75 = arith.addf %72, %74 : vector<2x64xf32>
    %c4 = arith.constant 4 : index
    %c0_44 = arith.constant 0 : index
    %76 = vector.load %arg10[%c4, %c0_44] : memref<8x64xf32, #tpu.memory_space<vmem>>, vector<1x64xf32>
    %77 = vector.broadcast %76 : vector<1x64xf32> to vector<2x64xf32>
    %78 = arith.addf %75, %77 : vector<2x64xf32>
    %79 = math.tanh %78 : vector<2x64xf32>
    %c0_45 = arith.constant 0 : index
    %c0_46 = arith.constant 0 : index
    %80 = vector.load %arg12[%c0_45, %c0_46] : memref<64x128xf32, #tpu.memory_space<vmem>>, vector<64x128xf32>
    %cst_47 = arith.constant dense<0.000000e+00> : vector<2x128xf32>
    %81 = tpu.matmul %79, %80, %cst_47 {dimension_numbers = #tpu.dot_dimension_numbers<[1], [0], [0], [1], [0, 0, 1, 1], [], []>} : vector<2x64xf32>, vector<64x128xf32>, vector<2x128xf32> -> vector<2x128xf32>
    %c0_48 = arith.constant 0 : index
    %c0_49 = arith.constant 0 : index
    %82 = vector.load %arg13[%c0_48, %c0_49] : memref<1x128xf32, #tpu.memory_space<vmem>>, vector<1x128xf32>
    %83 = vector.broadcast %82 : vector<1x128xf32> to vector<2x128xf32>
    %84 = arith.addf %81, %83 : vector<2x128xf32>
    %85 = tpu.iota {dimensions = array<i32: 1>} : vector<2x128xi32>
    %c16_i32 = arith.constant 16 : i32
    %86 = vector.broadcast %c16_i32 : i32 to vector<2x128xi32>
    %87 = arith.cmpi slt, %85, %86 : vector<2x128xi32>
    %88 = arith.mulf %84, %84 : vector<2x128xf32>
    %cst_50 = arith.constant 0.000000e+00 : f32
    %89 = vector.broadcast %cst_50 : f32 to vector<2x128xf32>
    %90 = arith.select %87, %88, %89 : vector<2x128xi1>, vector<2x128xf32>
    %cst_51 = arith.constant dense<0.000000e+00> : vector<2xf32>
    %91 = vector.multi_reduction <add>, %90, %cst_51 [1] : vector<2x128xf32> to vector<2xf32>
    %92 = vector.shape_cast %91 : vector<2xf32> to vector<2x1xf32>
    %cst_52 = arith.constant 1.000000e-24 : f32
    %93 = vector.broadcast %cst_52 : f32 to vector<2x1xf32>
    %94 = arith.maximumf %92, %93 : vector<2x1xf32>
    %95 = math.rsqrt %94 : vector<2x1xf32>
    %96 = vector.broadcast %95 : vector<2x1xf32> to vector<2x128xf32>
    %97 = arith.mulf %84, %96 : vector<2x128xf32>
    %98 = math.tanh %84 : vector<2x128xf32>
    %99 = arith.select %87, %97, %98 : vector<2x128xi1>, vector<2x128xf32>
    %c0_53 = arith.constant 0 : index
    %c0_54 = arith.constant 0 : index
    %100 = vector.load %arg14[%c0_53, %c0_54] : memref<2x128xf32, #tpu.memory_space<vmem>>, vector<2x128xf32>
    tpu.vector_store %arg14[%c0_53, %c0_54], %99 {strides = array<i32>} : memref<2x128xf32, #tpu.memory_space<vmem>>, vector<2x128xf32>,
    return
  }
  func.func @transform_0(%arg0: i32) -> (i32, i32) {
    %c0_i32 = arith.constant 0 : i32
    %c0_i32_0 = arith.constant 0 : i32
    return %arg0, %c0_i32 : i32, i32
  }
  func.func @transform_1(%arg0: i32) -> (i32, i32) {
    %c0_i32 = arith.constant 0 : i32
    %c0_i32_0 = arith.constant 0 : i32
    return %arg0, %c0_i32 : i32, i32
  }
  func.func @transform_2(%arg0: i32) -> (i32, i32) {
    %c0_i32 = arith.constant 0 : i32
    %c0_i32_0 = arith.constant 0 : i32
    return %arg0, %c0_i32 : i32, i32
  }
  func.func @transform_3(%arg0: i32) -> (i32, i32) {
    %c0_i32 = arith.constant 0 : i32
    %c0_i32_0 = arith.constant 0 : i32
    return %arg0, %c0_i32 : i32, i32
  }
  func.func @transform_4(%arg0: i32) -> (i32, i32) {
    %c0_i32 = arith.constant 0 : i32
    %c0_i32_0 = arith.constant 0 : i32
    return %arg0, %c0_i32 : i32, i32
  }
  func.func @transform_5(%arg0: i32) -> (i32, i32) {
    %c0_i32 = arith.constant 0 : i32
    %c0_i32_0 = arith.constant 0 : i32
    %c0_i32_1 = arith.constant 0 : i32
    return %c0_i32, %c0_i32_0 : i32, i32
  }
  func.func @transform_6(%arg0: i32) -> (i32, i32) {
    %c0_i32 = arith.constant 0 : i32
    %c0_i32_0 = arith.constant 0 : i32
    %c0_i32_1 = arith.constant 0 : i32
    return %c0_i32, %c0_i32_0 : i32, i32
  }
  func.func @transform_7(%arg0: i32) -> (i32, i32) {
    %c0_i32 = arith.constant 0 : i32
    %c0_i32_0 = arith.constant 0 : i32
    %c0_i32_1 = arith.constant 0 : i32
    return %c0_i32, %c0_i32_0 : i32, i32
  }
  func.func @transform_8(%arg0: i32) -> (i32, i32) {
    %c0_i32 = arith.constant 0 : i32
    %c0_i32_0 = arith.constant 0 : i32
    %c0_i32_1 = arith.constant 0 : i32
    return %c0_i32, %c0_i32_0 : i32, i32
  }
  func.func @transform_9(%arg0: i32) -> (i32, i32) {
    %c0_i32 = arith.constant 0 : i32
    %c0_i32_0 = arith.constant 0 : i32
    %c0_i32_1 = arith.constant 0 : i32
    return %c0_i32, %c0_i32_0 : i32, i32
  }
  func.func @transform_10(%arg0: i32) -> (i32, i32) {
    %c0_i32 = arith.constant 0 : i32
    %c0_i32_0 = arith.constant 0 : i32
    %c0_i32_1 = arith.constant 0 : i32
    return %c0_i32, %c0_i32_0 : i32, i32
  }
  func.func @transform_11(%arg0: i32) -> (i32, i32) {
    %c0_i32 = arith.constant 0 : i32
    %c0_i32_0 = arith.constant 0 : i32
    %c0_i32_1 = arith.constant 0 : i32
    return %c0_i32, %c0_i32_0 : i32, i32
  }
  func.func @transform_12(%arg0: i32) -> (i32, i32) {
    %c0_i32 = arith.constant 0 : i32
    %c0_i32_0 = arith.constant 0 : i32
    %c0_i32_1 = arith.constant 0 : i32
    return %c0_i32, %c0_i32_0 : i32, i32
  }
  func.func @transform_13(%arg0: i32) -> (i32, i32) {
    %c0_i32 = arith.constant 0 : i32
    %c0_i32_0 = arith.constant 0 : i32
    return %arg0, %c0_i32 : i32, i32
  }
}

</mosaic_0001>

<bundles_post_ra>
// kernel: actor_up_memaug_forward.1
= control target key start
LH: loop header
LB: loop body
LE: loop exit
PB: predicated region body
PF: predicated region fallthrough
CT: control target
= control target key end

     0   :  { %vm144_vm0 = vcmask 64512   ;;  %vm51_vm1 = vcmask 261120   ;;  %vm193_vm2 = vcmask 1043456   ;;  %vm189_vm3 = vcmask 31744   ;;  %s797_s5 = inlined_call_operand.vmem [shape: f32[32,64], index: 5, kind: input, shape index: {}]   ;;  %s798_s6 = inlined_call_operand.vmem [shape: f32[32,64], index: 6, kind: input, shape index: {}]   ;;  %s799_s7 = inlined_call_operand.vmem [shape: f32[8,64], index: 7, kind: input, shape index: {}]   ;;  %s800_s2 = inlined_call_operand.vmem [shape: f32[2,8], index: 2, kind: input, shape index: {}]   ;;  %s801_s0 = inlined_call_operand.vmem [shape: f32[2,32], index: 0, kind: input, shape index: {}]   ;;  %s802_s1 = inlined_call_operand.vmem [shape: f32[2,32], index: 1, kind: input, shape index: {}]   ;;  %s803_s8 = inlined_call_operand.vmem [shape: f32[4,64], index: 8, kind: input, shape index: {}]   ;;  %s804_s9 = inlined_call_operand.vmem [shape: f32[8,64], index: 9, kind: input, shape index: {}]   ;;  %s805_s3 = inlined_call_operand.vmem [shape: f32[2,4], index: 3, kind: input, shape index: {}]   ;;  %s806_s10 = inlined_call_operand.vmem [shape: f32[288,64], index: 10, kind: input, shape index: {}]   ;;  %s807_s4 = inlined_call_operand.vmem [shape: f32[2,32], index: 4, kind: input, shape index: {}]   ;;  %s808_s12 = inlined_call_operand.vmem [shape: f32[1,128], index: 12, kind: input, shape index: {}]   ;;  %s809_s11 = inlined_call_operand.vmem [shape: f32[64,128], index: 11, kind: input, shape index: {}]   ;;  %s810_s13 = inlined_call_operand.vmem [shape: f32[2,128], index: 13, kind: output, shape index: {}]  }
   0x1   :  { %v48_v0 = vld [vmem:[%s797_s5 + $0x18] sm:$0xff]  ;;  %v141_v2 = vld [vmem:[%s799_s7] sm:$0xff]  ;;  %v47_v4 = vld [vmem:[%s797_s5 + $0x10] sm:$0xff]  ;;  %vm76_vm4 = vcmask 517120  }
   0x2   :  { %v97_v1 = vld [vmem:[%s798_s6 + $0x18] sm:$0xff]  ;;  %67 = vmatpush.msra.mxu0 %v48_v0  ;;  %v140_v3 = vld [vmem:[%s800_s2] sm:$0x3]  ;;  %v96_v5 = vld [vmem:[%s798_s6 + $0x10] sm:$0xff]  ;;  %163 = vmatpush.msra.mxu2 %v141_v2 }
   0x3   :  { %115 = vmatpush.msra.mxu1 %v97_v1  ;;  %v46_v6 = vld [vmem:[%s797_s5 + $0x8] sm:$0xff]  ;;  %460 = vmatmul.msk.f32.vlgmr.msra.gmra.mxu2 %vm144_vm0, %v140_v3  ;;  %v45_v8 = vld [vmem:[%s797_s5] sm:$0xff]  ;;  %v251_v34 = vld [vmem:[%s806_s10 + $0x78] sm:$0xff]  ;;  %vm252_vm0 = vcmask 523264  }
   0x4   :  { %68 = vmatpush.msra.mxu0 %v47_v4  ;;  %v95_v7 = vld [vmem:[%s798_s6 + $0x8] sm:$0xff]  ;;  %v94_v9 = vld [vmem:[%s798_s6] sm:$0xff]  ;;  %v306_v35 = vld [vmem:[%s806_s10 + $0xb8] sm:$0xff]  ;;  %264 = vmatpush.msrb.mxu2 %v251_v34 }
   0x5   :  { %116 = vmatpush.msra.mxu1 %v96_v5  ;;  %v44_v10 = vld [vmem:[%s801_s0] sm:$0x3]  ;;  %v471_v15 = vld [vmem:[%s804_s9 + $0x2] ss:$0 sm:$0xff]  ;;  %v472_v25 = vld [vmem:[%s804_s9 + $0x3] ss:$0 sm:$0xff] }
   0x6   :  { %69 = vmatpush.msra.mxu0 %v46_v6  ;;  %v93_v11 = vld [vmem:[%s802_s1] sm:$0x3]  ;;  %v250_v36 = vld [vmem:[%s806_s10 + $0x70] sm:$0xff]  ;;  %v249_v38 = vld [vmem:[%s806_s10 + $0x68] sm:$0xff] }
   0x7   :  { %117 = vmatpush.msra.mxu1 %v95_v7  ;;  %v186_v12 = vld [vmem:[%s803_s8] sm:$0xf]  ;;  %v305_v37 = vld [vmem:[%s806_s10 + $0xb0] sm:$0xff]  ;;  %265 = vmatpush.msrb.mxu2 %v250_v36  ;;  %v304_v39 = vld [vmem:[%s806_s10 + $0xa8] sm:$0xff] }
   0x8   :  { %70 = vmatpush.msra.mxu0 %v45_v8  ;;  %v185_v13 = vld [vmem:[%s805_s3] sm:$0x3]  ;;  %v247_v42 = vld [vmem:[%s806_s10 + $0x58] sm:$0xff]  ;;  %v246_v46 = vld [vmem:[%s806_s10 + $0x50] sm:$0xff] }
   0x9   :  { %118 = vmatpush.msra.mxu1 %v94_v9  ;;  %458 = vmatmul.msk.f32.vlgmr.msra.gmra.mxu0 %vm51_vm1, %v44_v10  ;;  %v470_v14 = vld [vmem:[%s804_s9 + $0x1] ss:$0 sm:$0xff]  ;;  %v469_v16 = vld [vmem:[%s804_s9] ss:$0 sm:$0xff]  ;;  %v243_v43 = vld [vmem:[%s806_s10 + $0x38] sm:$0xff] }
   0xa   :  { %459 = vmatmul.msk.f32.vlgmr.msra.gmra.mxu1 %vm51_vm1, %v93_v11  ;;  %461 = vmatpush.msk.msrb.mxu0 %vm193_vm2, %v186_v12  ;;  %v248_v40 = vld [vmem:[%s806_s10 + $0x60] sm:$0xff]  ;;  %v302_v44 = vld [vmem:[%s806_s10 + $0x98] sm:$0xff]  ;;  %v242_v47 = vld [vmem:[%s806_s10 + $0x30] sm:$0xff] }
   0xb   :  { %266 = vmatpush.msrb.mxu2 %v249_v38  ;;  %v303_v41 = vld [vmem:[%s806_s10 + $0xa0] sm:$0xff]  ;;  %287 = vmatpush.msra.mxu3 %v243_v43  ;;  %v338_v45 = vld [vmem:[%s806_s10 + $0xf8] sm:$0xff]  ;;  %v301_v48 = vld [vmem:[%s806_s10 + $0x90] sm:$0xff] }
   0xc   :  { %318 = vmatpush.msra.mxu0 %v306_v35  ;;  %350 = vmatpush.msrb.mxu1 %v338_v45  ;;  %v337_v49 = vld [vmem:[%s806_s10 + $0xf0] sm:$0xff]  ;;  %v245_v50 = vld [vmem:[%s806_s10 + $0x48] sm:$0xff]  ;;  %v244_v54 = vld [vmem:[%s806_s10 + $0x40] sm:$0xff] }
   0xd   :  { %267 = vmatpush.msrb.mxu2 %v248_v40  ;;  %288 = vmatpush.msra.mxu3 %v242_v47  ;;  %v241_v51 = vld [vmem:[%s806_s10 + $0x28] sm:$0xff]  ;;  %v240_v55 = vld [vmem:[%s806_s10 + $0x20] sm:$0xff]  ;;  %v239_v58 = vld [vmem:[%s806_s10 + $0x18] sm:$0xff] }
   0xe   :  { %319 = vmatpush.msra.mxu0 %v305_v37  ;;  %351 = vmatpush.msrb.mxu1 %v337_v49  ;;  %v300_v52 = vld [vmem:[%s806_s10 + $0x88] sm:$0xff]  ;;  %v299_v56 = vld [vmem:[%s806_s10 + $0x80] sm:$0xff]  ;;  %v334_v59 = vld [vmem:[%s806_s10 + $0xd8] sm:$0xff] }
   0xf   :  { %268 = vmatpush.msrb.mxu2 %v247_v42  ;;  %289 = vmatpush.msra.mxu3 %v241_v51  ;;  %v336_v53 = vld [vmem:[%s806_s10 + $0xe8] sm:$0xff]  ;;  %v335_v57 = vld [vmem:[%s806_s10 + $0xe0] sm:$0xff]  ;;  %v238_v62 = vld [vmem:[%s806_s10 + $0x10] sm:$0xff] }
  0x10   :  { %320 = vmatpush.msra.mxu0 %v304_v39  ;;  %352 = vmatpush.msrb.mxu1 %v336_v53  ;;  %v333_v63 = vld [vmem:[%s806_s10 + $0xd0] sm:$0xff]  ;;  %v237_v2 = vld [vmem:[%s806_s10 + $0x8] sm:$0xff]  ;;  %v366_v3 = vld [vmem:[%s806_s10 + $0x118] sm:$0xff] }
  0x11   :  { %462 = vmatmul.msk.f32.vlgmr.msrb.gmra.mxu0 %vm189_vm3, %v185_v13  ;;  %269 = vmatpush.msrb.mxu2 %v246_v46  ;;  %v332_v4 = vld [vmem:[%s806_s10 + $0xc8] sm:$0xff]  ;;  %v236_v5 = vld [vmem:[%s806_s10] sm:$0xff]  ;;  %v365_v7 = vld [vmem:[%s806_s10 + $0x110] sm:$0xff]  ;;  %vm435_vm3 = vcmask 1041408  }
  0x12   :  { %321 = vmatpush.msra.mxu0 %v303_v41  ;;  %290 = vmatpush.msra.mxu3 %v240_v55  ;;  %v331_v6 = vld [vmem:[%s806_s10 + $0xc0] sm:$0xff]  ;;  %v364_v8 = vld [vmem:[%s806_s10 + $0x108] sm:$0xff] }
  0x13   :  { %270 = vmatpush.msrb.mxu2 %v245_v50  ;;  %353 = vmatpush.msrb.mxu1 %v335_v57  ;;  %v399_v55 = vld [vmem:[%s809_s11 + $0x20] sm:$0xff]  ;;  %v397_v57 = vld [vmem:[%s809_s11 + $0x10] sm:$0xff] }
  0x14   :  { %322 = vmatpush.msra.mxu0 %v302_v44  ;;  %291 = vmatpush.msra.mxu3 %v239_v58  ;;  %v396_v58 = vld [vmem:[%s809_s11 + $0x8] sm:$0xff] }
  0x15   :  { %271 = vmatpush.msrb.mxu2 %v244_v54  ;;  %354 = vmatpush.msrb.mxu1 %v334_v59  ;;  %v400_v54 = vld [vmem:[%s809_s11 + $0x28] sm:$0xff]  ;;  %v395_v59 = vld [vmem:[%s809_s11] sm:$0xff] }
  0x16   :  { %323 = vmatpush.msra.mxu0 %v301_v48  ;;  %292 = vmatpush.msra.mxu3 %v238_v62 }
  0x17   :  { %382 = vmatpush.msra.mxu2 %v366_v3  ;;  %355 = vmatpush.msrb.mxu1 %v333_v63 }
  0x18   :  { %324 = vmatpush.msra.mxu0 %v300_v52  ;;  %293 = vmatpush.msra.mxu3 %v237_v2 }
  0x19   :  { %356 = vmatpush.msrb.mxu1 %v332_v4  ;;  %383 = vmatpush.msra.mxu2 %v365_v7  ;;  %v473_v4 = vld [vmem:[%s804_s9 + $0x4] ss:$0 sm:$0xff] }
  0x1a   :  { %325 = vmatpush.msra.mxu0 %v299_v56  ;;  %294 = vmatpush.msra.mxu3 %v236_v5  ;;  %v398_v56 = vld [vmem:[%s809_s11 + $0x18] sm:$0xff] }
  0x1b   :  { %357 = vmatpush.msrb.mxu1 %v331_v6  ;;  %384 = vmatpush.msra.mxu2 %v364_v8  ;;  %v430_v8 = vlaneseq }
  0x86   :  { %v72_v17 = vpop.f32.mrf.mxu0  ;;  %v165_v19 = vpop.f32.mrf.mxu2 }
  0x87   :  { %v120_v18 = vpop.f32.mrf.mxu1  ;;  %v624_v21 = vadd.f32 %v471_v15, %v165_v19  ;;  %v626_v22 = vadd.f32 %v469_v16, %v72_v17 }
  0x88   :  { %v622_v20 = vadd.f32 %v470_v14, %v120_v18  ;;  %v363_v14 = vld [vmem:[%s806_s10 + $0x100] sm:$0xff] }
  0x89   :  { %v168_v23 = vmul.f32 %v624_v21, %v624_v21  ;;  %v75_v29 = vmul.f32 %v626_v22, %v626_v22  ;;  %385 = vmatpush.msra.mxu2 %v363_v14 }
  0x8a   :  { %v123_v24 = vmul.f32 %v622_v20, %v622_v20 }
  0x8b   :  { %v169_v26 = vsel %vm76_vm4, %v168_v23, 0.0  ;;  %v77_v32 = vsel %vm76_vm4, %v75_v29, 0.0 }
  0x8c   :  { %v124_v27 = vsel %vm76_vm4, %v123_v24, 0.0  ;;  %170 = vadd.xlane.f32.xlu1 %v169_v26 }
  0x8d   :  { %125 = vadd.xlane.f32.xlu0 %v124_v27 }
  0x8e   :  { %v214_v28 = vpop.f32.mrf.mxu0 }
  0x8f   :  { %v637_v30 = vadd.f32 %v472_v25, %v214_v28 }
  0x91   :  { %v217_v31 = vmul.f32 %v637_v30, %v637_v30 }
  0x93   :  { %v218_v33 = vsel %vm76_vm4, %v217_v31, 0.0 }
  0x94   :  { %219 = vadd.xlane.f32.xlu1 %v218_v33 }
  0x95   :  { %78 = vadd.xlane.f32.xlu0 %v77_v32 }
  0xff   :  { %v171_v60 = vpop.xlane.xlu1 %170 }
 0x100   :  { %v126_v61 = vpop.xlane.xlu0 %125  ;;  %v172_v0 = vmax.f32 %v171_v60, 1e-24 }
 0x101   :  { %v127_v1 = vmax.f32 %v126_v61, 1e-24 }
 0x102   :  { %475 = vrsqrt.f32 %v172_v0  ;;  %vm179_vm5 = vweird.f32 %v172_v0 }
 0x103   :  { %477 = vrsqrt.f32 %v127_v1  ;;  %vm134_vm9 = vweird.f32 %v127_v1 }
 0x107   :  { %v220_v9 = vpop.xlane.xlu1 %219 }
 0x108   :  { %v79_v10 = vpop.xlane.xlu0 %78  ;;  %v476_v11 = vpop.eup %475  ;;  %v221_v12 = vmax.f32 %v220_v9, 1e-24  ;;  %v474_v9 = vld [vmem:[%s808_s12] ss:$0 sm:$0xff] }
 0x109   :  { %v80_v13 = vmax.f32 %v79_v10, 1e-24  ;;  %v478_v15 = vpop.eup %477  ;;  %v174_v16 = vmul.f32 %v476_v11, %v172_v0  ;;  %vm180_vm6 = vweird.f32 %v476_v11  ;;  %v431_v10 = vand.u32 127, %v430_v8 }
 0x10a   :  { %v129_v17 = vmul.f32 %v478_v15, %v127_v1  ;;  %479 = vrsqrt.f32 %v221_v12  ;;  %vm135_vm7 = vweird.f32 %v478_v15  ;;  %vm181_vm8 = vmor %vm179_vm5, %vm180_vm6  ;;  %vm228_vm11 = vweird.f32 %v221_v12 }
 0x10b   :  { %v175_v18 = vmul.f32 %v476_v11, %v174_v16  ;;  %481 = vrsqrt.f32 %v80_v13  ;;  %vm136_vm10 = vmor %vm134_vm9, %vm135_vm7  ;;  %vm87_vm15 = vweird.f32 %v80_v13 }
 0x10c   :  { %v130_v19 = vmul.f32 %v478_v15, %v129_v17 }
 0x10d   :  { %v176_v23 = vmul.f32 0.5, %v175_v18 }
 0x10e   :  { %v131_v24 = vmul.f32 0.5, %v130_v19 }
 0x10f   :  { %v177_v25 = vsub.f32 1.5, %v176_v23 }
 0x110   :  { %v480_v26 = vpop.eup %479  ;;  %v132_v27 = vsub.f32 1.5, %v131_v24 }
 0x111   :  { %v482_v28 = vpop.eup %481  ;;  %v178_v29 = vmul.f32 %v476_v11, %v177_v25  ;;  %v223_v31 = vmul.f32 %v480_v26, %v221_v12  ;;  %vm229_vm12 = vweird.f32 %v480_v26 }
 0x112   :  { %v133_v32 = vmul.f32 %v478_v15, %v132_v27  ;;  %v82_v33 = vmul.f32 %v482_v28, %v80_v13  ;;  %vm88_vm13 = vweird.f32 %v482_v28  ;;  %vm230_vm14 = vmor %vm228_vm11, %vm229_vm12 }
 0x113   :  { %v182_v34 = vsel %vm181_vm8, %v476_v11, %v178_v29  ;;  %v224_v35 = vmul.f32 %v480_v26, %v223_v31  ;;  %vm89_vm2 = vmor %vm87_vm15, %vm88_vm13 }
 0x114   :  { %v183_v36 = vmul.f32 %v182_v34, %v624_v21  ;;  %v137_v37 = vsel %vm136_vm10, %v478_v15, %v133_v32  ;;  %v83_v38 = vmul.f32 %v482_v28, %v82_v33  ;;  %v234_v21 = vld [vmem:[%s807_s4] sm:$0x3] }
 0x115   :  { %v138_v39 = vmul.f32 %v137_v37, %v622_v20  ;;  %v225_v40 = vmul.f32 0.5, %v224_v35 }
 0x116   :  { %483 = vtanh.f32 %v183_v36  ;;  %v84_v41 = vmul.f32 0.5, %v83_v38 }
 0x117   :  { %485 = vtanh.f32 %v138_v39  ;;  %v226_v42 = vsub.f32 1.5, %v225_v40 }
 0x118   :  { %v85_v43 = vsub.f32 1.5, %v84_v41  ;;  %487 = vtanh.f32 %v234_v21 }
 0x119   :  { %v227_v44 = vmul.f32 %v480_v26, %v226_v42 }
 0x11a   :  { %v86_v45 = vmul.f32 %v482_v28, %v85_v43 }
 0x11b   :  { %v231_v46 = vsel %vm230_vm14, %v480_v26, %v227_v44 }
 0x11c   :  { %v484_v20 = vpop.eup %483  ;;  %v232_v47 = vmul.f32 %v231_v46, %v637_v30  ;;  %v90_v48 = vsel %vm89_vm2, %v482_v28, %v86_v45  ;;  %v401_v30 = vld [vmem:[%s809_s11 + $0x30] sm:$0xff] }
 0x11d   :  { %v486_v49 = vpop.eup %485  ;;  %v91_v50 = vmul.f32 %v90_v48, %v626_v22  ;;  %465 = vmatmul.msk.f32.vlgmr.msra.gmra.mxu0 %vm252_vm0, %v484_v20  ;;  %v402_v22 = vld [vmem:[%s809_s11 + $0x38] sm:$0xff] }
 0x11e   :  { %489 = vtanh.f32 %v232_v47  ;;  %463 = vmatmul.msk.f32.vlgmr.msrb.gmra.mxu2 %vm252_vm0, %v486_v49  ;;  %v488_v51 = vpop.eup %487  ;;  %418 = vmatpush.msrb.mxu3 %v402_v22 }
 0x11f   :  { %491 = vtanh.f32 %v91_v50 }
 0x120   :  { %419 = vmatpush.msrb.mxu3 %v401_v30 }
 0x122   :  { %420 = vmatpush.msrb.mxu3 %v400_v54 }
 0x124   :  { %v490_v52 = vpop.eup %489  ;;  %421 = vmatpush.msrb.mxu3 %v399_v55 }
 0x125   :  { %v492_v53 = vpop.eup %491  ;;  %466 = vmatmul.msk.f32.vlgmr.msrb.gmra.mxu1 %vm252_vm0, %v490_v52 }
 0x126   :  { %464 = vmatmul.msk.f32.vlgmr.msra.gmra.mxu3 %vm252_vm0, %v492_v53  ;;  %467 = vmatmul.msk.f32.vlgmr.msra.gmra.mxu2 %vm51_vm1, %v488_v51  ;;  %vm432_vm1 = vcmp.lt.s32.totalorder %v431_v10, 16 }
 0x127   :  { %422 = vmatpush.msrb.mxu3 %v398_v56 }
 0x129   :  { %423 = vmatpush.msrb.mxu3 %v397_v57 }
 0x12b   :  { %424 = vmatpush.msrb.mxu3 %v396_v58 }
 0x12d   :  { %425 = vmatpush.msrb.mxu3 %v395_v59 }
 0x19a   :  { %v327_v63 = vpop.f32.mrf.mxu0 }
 0x1a1   :  { %v273_v60 = vpop.f32.mrf.mxu2 }
 0x1a2   :  { %v359_v1 = vpop.f32.mrf.mxu1 }
 0x1a9   :  { %v296_v61 = vpop.f32.mrf.mxu3  ;;  %v387_v2 = vpop.f32.mrf.mxu2 }
 0x1aa   :  { %v297_v62 = vadd.f32 %v296_v61, %v273_v60 }
 0x1ac   :  { %v330_v0 = vadd.f32 %v327_v63, %v297_v62 }
 0x1ae   :  { %v362_v3 = vadd.f32 %v359_v1, %v330_v0 }
 0x1b0   :  { %v390_v5 = vadd.f32 %v387_v2, %v362_v3 }
 0x1b2   :  { %v393_v6 = vadd.f32 %v473_v4, %v390_v5 }
 0x1b4   :  { %493 = vtanh.f32 %v393_v6 }
 0x1ba   :  { %v494_v7 = vpop.eup %493 }
 0x1bb   :  { %468 = vmatmul.msk.f32.vlgmr.msrb.gmra.mxu3 %vm252_vm0, %v494_v7 }
 0x23e   :  { %v427_v11 = vpop.f32.mrf.mxu3 }
 0x23f   :  { %v428_v12 = vadd.f32 %v474_v9, %v427_v11 }
 0x241   :  { %v433_v13 = vmul.f32 %v428_v12, %v428_v12 }
 0x243   :  { %v434_v14 = vsel %vm432_vm1, %v433_v13, 0.0 }
 0x244   :  { %v436_v15 = vsel %vm435_vm3, %v434_v14, 0.0 }
 0x245   :  { %437 = vadd.xlane.f32.xlu2 %v436_v15 }
 0x2b8   :  { %v438_v16 = vpop.xlane.xlu2 %437 }
 0x2b9   :  { %v439_v17 = vmax.f32 %v438_v16, 1e-24 }
 0x2bb   :  { %495 = vrsqrt.f32 %v439_v17  ;;  %vm446_vm5 = vweird.f32 %v439_v17 }
 0x2bc   :  { %497 = vtanh.f32 %v428_v12 }
 0x2c1   :  { %v496_v18 = vpop.eup %495 }
 0x2c2   :  { %v441_v19 = vmul.f32 %v496_v18, %v439_v17  ;;  %vm447_vm4 = vweird.f32 %v496_v18  ;;  %v498_v29 = vpop.eup %497 }
 0x2c3   :  { %vm448_vm6 = vmor %vm446_vm5, %vm447_vm4 }
 0x2c4   :  { %v442_v23 = vmul.f32 %v496_v18, %v441_v19 }
 0x2c6   :  { %v443_v24 = vmul.f32 0.5, %v442_v23 }
 0x2c8   :  { %v444_v25 = vsub.f32 1.5, %v443_v24 }
 0x2ca   :  { %v445_v26 = vmul.f32 %v496_v18, %v444_v25 }
 0x2cc   :  { %v449_v27 = vsel %vm448_vm6, %v496_v18, %v445_v26 }
 0x2cd   :  { %v450_v28 = vmul.f32 %v449_v27, %v428_v12 }
 0x2cf   :  { %v452_v31 = vsel %vm432_vm1, %v450_v28, %v498_v29 }
 0x2d0   :  { %453 = vst [vmem:[%s810_s13] sm:$0x3] %v452_v31 }

</bundles_post_ra>
